<compile_context>
chip_gen: v6e
topology: v6e:2x2x1
jax: 0.10.0
libtpu: 0.0.40
codegen_flags: <defaults>
</compile_context>

<pallas_src>
import jax
import jax.numpy as jnp
from jax import lax
from jax.experimental import pallas as pl
from jax.experimental.pallas import tpu as pltpu

LANES = 128
TARGET_BLOCK_ROWS = 2048  # 2048 x 128 f32 = 1 MiB per pipelined input buffer


def _make_rmsle_kernel(rows, block_rows, blocks_per_shard, needs_mask):
    def kernel(yt_ref, yp_ref, o_ref, acc_ref):
        s = pl.program_id(0)   # shard (parallel axis, megacore split on v7x)
        j = pl.program_id(1)   # row-block within the shard (reduction axis)

        @pl.when(j == 0)
        def _():
            acc_ref[...] = jnp.zeros_like(acc_ref)

        logical_block = s * blocks_per_shard + j
        row0 = logical_block * block_rows

        def accumulate():
            d = jnp.log1p(yt_ref[...].astype(jnp.float32)) - jnp.log1p(
                yp_ref[...].astype(jnp.float32)
            )
            sq = d * d
            if needs_mask:
                # Mask rows past the real array extent (garbage in partial
                # edge blocks). jnp.where drops any NaNs produced from the
                # garbage data in the unselected branch.
                row_ids = row0 + lax.broadcasted_iota(jnp.int32, sq.shape, 0)
                sq = jnp.where(row_ids < rows, sq, 0.0)
            acc_ref[...] += sq  # elementwise only; no per-step XLU reduce

        if needs_mask:
            # Skip all EUP/VPU work for blocks that are entirely out of
            # range (the clamped, duplicated overhang blocks).
            pl.when(row0 < rows)(accumulate)
        else:
            accumulate()

        @pl.when(j == pl.num_programs(1) - 1)
        def _():
            o_ref[0, 0] = jnp.sum(acc_ref[...])  # single XLU reduce per shard

    return kernel


def rmsle(y_true: jax.Array, y_pred: jax.Array) -> jax.Array:
    assert y_true.shape == y_pred.shape
    total_n = y_true.size

    # Flatten in native dtype (kernel upcasts to f32 in VMEM). Pad only the
    # lane tail when total_n is not a multiple of 128.
    # TODO(synk): a non-128-multiple element count still forces one pad copy;
    # fully eliminating it would need a 1-D block layout with lane masking.
    yt = jnp.ravel(y_true)
    yp = jnp.ravel(y_pred)
    rows = pl.cdiv(total_n, LANES)
    padded_n = rows * LANES
    if padded_n != total_n:
        yt = jnp.pad(yt, (0, padded_n - total_n))
        yp = jnp.pad(yp, (0, padded_n - total_n))
    yt = yt.reshape(rows, LANES)
    yp = yp.reshape(rows, LANES)

    if rows <= TARGET_BLOCK_ROWS:
        block_rows = rows               # full-extent block (always legal)
        nblocks = 1
    else:
        block_rows = TARGET_BLOCK_ROWS  # multiple of 8 (and 16 for bf16)
        nblocks = pl.cdiv(rows, block_rows)

    # Two shards -> megacore split on v7x; a cheap serial loop on 1-TC chips.
    num_shards = 2 if nblocks >= 2 else 1
    blocks_per_shard = pl.cdiv(nblocks, num_shards)
    needs_mask = num_shards * blocks_per_shard * block_rows > rows

    def in_index_map(s, j):
        blk = s * blocks_per_shard + j
        # Clamp so an overhanging grid step never DMAs a fully out-of-bounds
        # block; its contribution is skipped/zeroed in-kernel.
        return (jnp.minimum(blk, nblocks - 1), 0)

    itemsize = jnp.dtype(y_true.dtype).itemsize
    cost = pl.CostEstimate(
        flops=3 * total_n,
        transcendentals=2 * total_n,
        bytes_accessed=2 * total_n * itemsize + num_shards * 4,
    )

    partials = pl.pallas_call(
        _make_rmsle_kernel(rows, block_rows, blocks_per_shard, needs_mask),
        out_shape=jax.ShapeDtypeStruct((num_shards, 1), jnp.float32),
        grid_spec=pltpu.PrefetchScalarGridSpec(
            num_scalar_prefetch=0,
            grid=(num_shards, blocks_per_shard),
            in_specs=[
                pl.BlockSpec((block_rows, LANES), in_index_map),
                pl.BlockSpec((block_rows, LANES), in_index_map),
            ],
            out_specs=pl.BlockSpec(
                (1, 1), lambda s, j: (s, 0), memory_space=pltpu.SMEM
            ),
            scratch_shapes=[pltpu.VMEM((block_rows, LANES), jnp.float32)],
        ),
        compiler_params=pltpu.CompilerParams(
            dimension_semantics=("parallel", "arbitrary"),
        ),
        cost_estimate=cost,
    )(yt, yp)

    # Finalize across shards in the wrapper.
    return jnp.sqrt(jnp.sum(partials) / total_n)


def _reference(y_true, y_pred):
    return jnp.sqrt(
        jnp.mean(
            (
                jnp.log1p(y_true.astype(jnp.float32))
                - jnp.log1p(y_pred.astype(jnp.float32))
            )
            ** 2
        )
    )


if __name__ == "__main__":
    key = jax.random.PRNGKey(0)

    # Small NCHW case from the module spec, plus two shapes that exercise the
    # lane-tail padding and the multi-block / 2-shard / masked-tail paths.
    cases = [
        (2, 4, 16, 16),    # aligned, single block, single shard
        (3, 5, 7, 11),     # 1155 elems -> lane-tail zero padding
        (2, 4, 256, 320),  # 655360 elems -> 3 row-blocks, 2 shards, masking
    ]
    for idx, shape in enumerate(cases):
        k1, k2 = jax.random.split(jax.random.fold_in(key, idx))
        y_true = jax.random.uniform(k1, shape, dtype=jnp.float32)
        y_pred = jax.random.uniform(k2, shape, dtype=jnp.float32)

        out = rmsle(y_true, y_pred)
        jax.block_until_ready(out)

        ref = _reference(y_true, y_pred)
        assert jnp.allclose(out, ref, rtol=1e-4, atol=1e-6), (shape, out, ref)

    print("KERNEL_OK")
</pallas_src>

<mosaic_0001>
module attributes {stable_mosaic.version = 11 : i64} {
  func.func @kernel(%arg0: i32, %arg1: i32, %arg2: memref<16x128xf32, #tpu.memory_space<vmem>>, %arg3: memref<16x128xf32, #tpu.memory_space<vmem>>, %arg4: memref<1x1xf32, #tpu.memory_space<smem>>, %arg5: memref<16x128xf32, #tpu.memory_space<vmem>>) attributes {dimension_semantics = [#tpu.dimension_semantics<parallel>, #tpu.dimension_semantics<arbitrary>], iteration_bounds = array<i64: 1, 1>, scalar_prefetch = 0 : i64, scratch_operands = 1 : i64, tpu.core_type = #tpu.core_type<tc>, window_params = [{transform_indices = @transform_0, window_bounds = array<i64: 16, 128>}, {transform_indices = @transform_1, window_bounds = array<i64: 16, 128>}, {transform_indices = @transform_2, window_bounds = array<i64: 1, 1>}]} {
    %c0_i32 = arith.constant 0 : i32
    %0 = arith.cmpi eq, %arg1, %c0_i32 : i32
    %1 = arith.extui %0 : i1 to i32
    %c0_i32_0 = arith.constant 0 : i32
    %2 = arith.cmpi ne, %1, %c0_i32_0 : i32
    scf.if %2 {
      %cst = arith.constant 0.000000e+00 : f32
      %15 = vector.broadcast %cst : f32 to vector<16x128xf32>
      %c0_10 = arith.constant 0 : index
      %c0_11 = arith.constant 0 : index
      %16 = vector.load %arg5[%c0_10, %c0_11] : memref<16x128xf32, #tpu.memory_space<vmem>>, vector<16x128xf32>
      tpu.vector_store %arg5[%c0_10, %c0_11], %15 {strides = array<i32>} : memref<16x128xf32, #tpu.memory_space<vmem>>, vector<16x128xf32>,
    } else {
    }
    %c0 = arith.constant 0 : index
    %c0_1 = arith.constant 0 : index
    %3 = vector.load %arg2[%c0, %c0_1] : memref<16x128xf32, #tpu.memory_space<vmem>>, vector<16x128xf32>
    %4 = math.log1p %3 : vector<16x128xf32>
    %c0_2 = arith.constant 0 : index
    %c0_3 = arith.constant 0 : index
    %5 = vector.load %arg3[%c0_2, %c0_3] : memref<16x128xf32, #tpu.memory_space<vmem>>, vector<16x128xf32>
    %6 = math.log1p %5 : vector<16x128xf32>
    %7 = arith.subf %4, %6 : vector<16x128xf32>
    %8 = arith.mulf %7, %7 : vector<16x128xf32>
    %c0_4 = arith.constant 0 : index
    %c0_5 = arith.constant 0 : index
    %9 = vector.load %arg5[%c0_4, %c0_5] : memref<16x128xf32, #tpu.memory_space<vmem>>, vector<16x128xf32>
    %10 = arith.addf %9, %8 : vector<16x128xf32>
    %c0_6 = arith.constant 0 : index
    %c0_7 = arith.constant 0 : index
    %11 = vector.load %arg5[%c0_6, %c0_7] : memref<16x128xf32, #tpu.memory_space<vmem>>, vector<16x128xf32>
    tpu.vector_store %arg5[%c0_6, %c0_7], %10 {strides = array<i32>} : memref<16x128xf32, #tpu.memory_space<vmem>>, vector<16x128xf32>,
    %c0_i32_8 = arith.constant 0 : i32
    %12 = arith.cmpi eq, %arg1, %c0_i32_8 : i32
    %13 = arith.extui %12 : i1 to i32
    %c0_i32_9 = arith.constant 0 : i32
    %14 = arith.cmpi ne, %13, %c0_i32_9 : i32
    scf.if %14 {
      %c0_10 = arith.constant 0 : index
      %c0_11 = arith.constant 0 : index
      %15 = vector.load %arg5[%c0_10, %c0_11] : memref<16x128xf32, #tpu.memory_space<vmem>>, vector<16x128xf32>
      %16 = vector.shape_cast %15 : vector<16x128xf32> to vector<1x16x128xf32>
      %cst = arith.constant dense<0.000000e+00> : vector<1xf32>
      %17 = vector.multi_reduction <add>, %16, %cst [1, 2] : vector<1x16x128xf32> to vector<1xf32>
      %18 = vector.shape_cast %17 : vector<1xf32> to vector<1x1x1xf32>
      %19 = vector.extract %18[0, 0, 0] : f32 from vector<1x1x1xf32>
      %c0_12 = arith.constant 0 : index
      %c0_13 = arith.constant 0 : index
      %20 = memref.load %arg4[%c0_12, %c0_13] : memref<1x1xf32, #tpu.memory_space<smem>>
      memref.store %19, %arg4[%c0_12, %c0_13] : memref<1x1xf32, #tpu.memory_space<smem>>
    } else {
    }
    return
  }
  func.func @transform_0(%arg0: i32, %arg1: i32) -> (i32, i32) {
    %c1_i32 = arith.constant 1 : i32
    %0 = arith.muli %arg0, %c1_i32 : i32
    %1 = arith.addi %0, %arg1 : i32
    %c0_i32 = arith.constant 0 : i32
    %2 = arith.minsi %1, %c0_i32 : i32
    %c0_i32_0 = arith.constant 0 : i32
    %c0_i32_1 = arith.constant 0 : i32
    return %2, %c0_i32_0 : i32, i32
  }
  func.func @transform_1(%arg0: i32, %arg1: i32) -> (i32, i32) {
    %c1_i32 = arith.constant 1 : i32
    %0 = arith.muli %arg0, %c1_i32 : i32
    %1 = arith.addi %0, %arg1 : i32
    %c0_i32 = arith.constant 0 : i32
    %2 = arith.minsi %1, %c0_i32 : i32
    %c0_i32_0 = arith.constant 0 : i32
    %c0_i32_1 = arith.constant 0 : i32
    return %2, %c0_i32_0 : i32, i32
  }
  func.func @transform_2(%arg0: i32, %arg1: i32) -> (i32, i32) {
    %c0_i32 = arith.constant 0 : i32
    %c0_i32_0 = arith.constant 0 : i32
    return %arg0, %c0_i32 : i32, i32
  }
}

</mosaic_0001>

<bundles_post_ra>
// kernel: tpu_custom_call.1
= control target key start
LH: loop header
LB: loop body
LE: loop exit
PB: predicated region body
PF: predicated region fallthrough
CT: control target
= control target key end

     0   :  { %7 = vsyncpa [#allocation4], 0  ;;  %s256_s0 = inlined_call_operand.hbm [shape: f32[16,128], index: 0, kind: input, shape index: {}]   ;;  %s257_s1 = inlined_call_operand.hbm [shape: f32[16,128], index: 1, kind: input, shape index: {}]   ;;  %s258_s2 = inlined_call_operand.hbm [shape: f32[1,1], index: 2, kind: output, shape index: {}]  }
   0x1   :  { %8 = vsyncpa [#allocation7], 0 }
   0x2   :  { %9 = vsyncpa [#allocation5], 0  ;;  %s221_s9 = smov [#allocation3]  }
   0x3   :  { %s21_s10 = sshll.u32 %s221_s9, 4  ;;  %s22_s10 = int_to_ptr.vmem [resolvable:$true] %s21_s10 }
   0x4   :  { %s175_s11 = scalar_lea.vmem %s22_s10, 256  ;;  %p180_p1 = scmp.lt.s32.totalorder %s22_s10, %s22_s10 }
   0x5   :  { %p176_p0 = scmp.ne.s32.totalorder %s22_s10, %s175_s11  ;;  %p181_p2 = scmp.lt.s32.totalorder %s175_s11, %s175_s11 }
   0x7   :  { %p182_p3 = por %p181_p2, %p180_p1 }
   0x9   :  { %p183_p4 = pnand %p182_p3, %p176_p0 }
   0xb   :  { %186 = shalt.err (!%p183_p4)
}
   0xc   :  { %s222_s12 = smov 128   ;;  %s223_s13 = smov 8  }
   0xd   :  { %27 = dma.hbm_to_vmem [thread:$0]  %s256_s0, 256, %s22_s10, [#allocation4], %s222_s12, %s222_s12, %s223_s13  }
   0xe   :  { %s224_s16 = smov [#allocation6]  }
   0xf   :  { %s39_s17 = sshll.u32 %s224_s16, 4  ;;  %s40_s17 = int_to_ptr.vmem [resolvable:$true] %s39_s17 }
  0x10   :  { %s195_s18 = scalar_lea.vmem %s40_s17, 256  ;;  %p200_p6 = scmp.lt.s32.totalorder %s40_s17, %s40_s17 }
  0x11   :  { %p196_p5 = scmp.ne.s32.totalorder %s40_s17, %s195_s18  ;;  %p201_p7 = scmp.lt.s32.totalorder %s195_s18, %s195_s18 }
  0x13   :  { %p202_p8 = por %p201_p7, %p200_p6 }
  0x15   :  { %p203_p9 = pnand %p202_p8, %p196_p5 }
  0x17   :  { %206 = shalt.err (!%p203_p9)
}
  0x18   :  { %45 = dma.hbm_to_vmem [thread:$0]  %s257_s1, 256, %s40_s17, [#allocation7], %s222_s12, %s222_s12, %s223_s13  }
  0x19   :  { %215 = dma.done.wait [#allocation4], 256  }
  0x1a   :  { %216 = vsyncadd [#allocation4], 4294967040 }
  0x1b   :  { %217 = dma.done.wait [#allocation7], 256  }
  0x1c   :  { %218 = vsyncadd [#allocation7], 4294967040  ;;  %v66_v0 = vld [vmem:[#allocation3] sm:$0xff]  ;;  %v67_v1 = vld [vmem:[#allocation3 + $0x8] sm:$0xff]  ;;  %s225_s1 = smov [#allocation8]  }
  0x1d   :  { %v86_v2 = vld [vmem:[#allocation6] sm:$0xff]  ;;  %v68_v3 = vadd.f32 1.0, %v66_v0  ;;  %v77_v4 = vadd.f32 1.0, %v67_v1  ;;  %v87_v5 = vld [vmem:[#allocation6 + $0x8] sm:$0xff]  ;;  %v71_v8 = vmul.f32 -0.5, %v66_v0  ;;  %v80_v9 = vmul.f32 -0.5, %v67_v1 }
  0x1e   :  { %v88_v6 = vadd.f32 1.0, %v86_v2  ;;  %v97_v7 = vadd.f32 1.0, %v87_v5  ;;  %v91_v10 = vmul.f32 -0.5, %v86_v2  ;;  %v100_v12 = vmul.f32 -0.5, %v87_v5 }
  0x1f   :  { %159 = vlog2.f32 %v68_v3  ;;  %v72_v11 = vadd.f32 1.0, %v71_v8  ;;  %v74_v13 = vand.u32 2147483647, %v66_v0  ;;  %v81_v14 = vadd.f32 1.0, %v80_v9 }
  0x20   :  { %161 = vlog2.f32 %v77_v4  ;;  %v92_v15 = vadd.f32 1.0, %v91_v10  ;;  %v83_v16 = vand.u32 2147483647, %v67_v1  ;;  %v94_v17 = vand.u32 2147483647, %v86_v2 }
  0x21   :  { %163 = vlog2.f32 %v88_v6  ;;  %v73_v18 = vmul.f32 %v72_v11, %v66_v0  ;;  %v101_v19 = vadd.f32 1.0, %v100_v12  ;;  %vm247_vm0 = vcmp.lt.f32.partialorder %v74_v13, 0.0004427343 }
  0x22   :  { %165 = vlog2.f32 %v97_v7  ;;  %v103_v22 = vand.u32 2147483647, %v87_v5  ;;  %v82_v25 = vmul.f32 %v81_v14, %v67_v1  ;;  %v93_v26 = vmul.f32 %v92_v15, %v86_v2 }
  0x23   :  { %vm84_vm1 = vcmp.lt.f32.partialorder %v83_v16, 0.0004427343  ;;  %vm95_vm2 = vcmp.lt.f32.partialorder %v94_v17, 0.0004427343  ;;  %v102_v31 = vmul.f32 %v101_v19, %v87_v5 }
  0x24   :  { %vm104_vm3 = vcmp.lt.f32.partialorder %v103_v22, 0.0004427343 }
  0x2c   :  { %v160_v20 = vpop.eup %159 }
  0x2d   :  { %v162_v23 = vpop.eup %161  ;;  %v70_v24 = vmul.f32 0.6931472, %v160_v20 }
  0x2e   :  { %v164_v27 = vpop.eup %163  ;;  %v79_v28 = vmul.f32 0.6931472, %v162_v23 }
  0x2f   :  { %v76_v29 = vsel %vm247_vm0, %v73_v18, %v70_v24  ;;  %v90_v30 = vmul.f32 0.6931472, %v164_v27  ;;  %v166_v32 = vpop.eup %165 }
  0x30   :  { %v85_v33 = vsel %vm84_vm1, %v82_v25, %v79_v28  ;;  %v99_v35 = vmul.f32 0.6931472, %v166_v32 }
  0x31   :  { %v96_v34 = vsel %vm95_vm2, %v93_v26, %v90_v30 }
  0x32   :  { %v106_v36 = vsub.f32 %v76_v29, %v96_v34  ;;  %v105_v37 = vsel %vm104_vm3, %v102_v31, %v99_v35 }
  0x33   :  { %v107_v38 = vsub.f32 %v85_v33, %v105_v37 }
  0x34   :  { %v108_v39 = vmul.f32 %v106_v36, %v106_v36 }
  0x35   :  { %v109_v40 = vmul.f32 %v107_v38, %v107_v38 }
  0x37   :  { %v121_v41 = vadd.f32 %v109_v40, %v108_v39 }
  0x39   :  { %122 = vadd.xlane.f32.xlu0 %v121_v41 }
  0xc2   :  { %v123_v42 = vpop.xlane.xlu0 %122 }
  0xc3   :  { %v124_v43 = vrot.slane %v123_v42, 4 }
  0xc5   :  { %v125_v44 = vadd.f32 %v124_v43, %v123_v42 }
  0xc7   :  { %v126_v45 = vrot.slane %v125_v44, 2 }
  0xc9   :  { %v127_v46 = vadd.f32 %v126_v45, %v125_v44 }
  0xcb   :  { %v128_v47 = vrot.slane %v127_v46, 1 }
  0xcd   :  { %v129_v48 = vadd.f32 %v128_v47, %v127_v46 }
  0xcf   :  { %152 = vpush %v129_v48 }
 0x100   :  { %s153_s0 = spop %152 }
 0x101   :  { %132 = sst [smem:[#allocation8]] %s153_s0 }
 0x102   :  { %140 = dma.smem_to_hbm %s225_s1, 16, %s258_s2, [#allocation5]  }
 0x103   :  { %219 = dma.done.wait [#allocation5], 16  }
 0x104   :  { %220 = vsyncadd [#allocation5], 4294967280 }
 0x105   :  { %144 = sfence }
 0x106   :  { %145 = vsyncpa [#allocation4], 1 }
 0x107   :  { %146 = vsyncpa [#allocation7], 1 }
 0x108   :  { %147 = vsyncpa [#allocation5], 1 }

</bundles_post_ra>
